<compile_context>
chip_gen: v5e
topology: v5e:2x2
jax: 0.10.0
libtpu: 0.0.40
codegen_flags: <defaults>
</compile_context>

<pallas_src>
import functools

import jax
import jax.numpy as jnp
from jax.experimental import pallas as pl
from jax.experimental.pallas import tpu as pltpu


def _round_up(x, m):
    return ((x + m - 1) // m) * m


def _tensorcores_per_device():
    """Best-effort TensorCore count per JAX device (megacore / v7x -> 2)."""
    try:
        kind = jax.devices()[0].device_kind.lower()
    except Exception:
        return 1
    if "lite" in kind or "v5e" in kind or "v6e" in kind:
        return 1          # single-TensorCore generations
    if "v2" in kind or "v3" in kind:
        return 1          # each core is already a separate JAX device
    if "v4" in kind or "v5p" in kind or "v7" in kind or "v5" in kind:
        return 2          # megacore / dual-TC chips
    return 1


def _vmem_limit_bytes():
    """Explicit scoped-VMEM limit, gated on the chip's actual VMEM size."""
    cap = None
    try:
        info = pltpu.get_tpu_info()
        cap = getattr(info, "vmem_capacity_bytes", None)
    except Exception:
        cap = None
    if not cap:
        cap = 64 * 1024 * 1024      # conservative: v7x per-TensorCore VMEM
    return min(32 * 1024 * 1024, int(cap) // 2)


def _static_pow(x, g):
    """x ** g for x >= 0 with a *static* Python float g.

    Uses VPU multiply chains for the integer part and sqrt for the .5 case
    (gamma=2.0 -> x*x, gamma=2.5 -> x*x*sqrt(x)); only falls back to
    exp(frac * log(x)) on the EUP for odd fractional gammas (e.g. 1.6).
    """
    g = float(g)
    if g == 0.0:
        return jnp.ones_like(x)
    ig = int(g)
    frac = g - ig
    out = None
    if ig > 0:
        r = x
        for _ in range(ig - 1):
            r = r * x
        out = r
    if frac > 1e-12:
        if abs(frac - 0.5) < 1e-9:
            f = jnp.sqrt(x)
        else:
            safe = jnp.maximum(x, jnp.float32(1e-30))
            f = jnp.where(x > 0,
                          jnp.exp(jnp.float32(frac) * jnp.log(safe)),
                          jnp.zeros_like(x))
        out = f if out is None else out * f
    return out if out is not None else jnp.ones_like(x)


def _focal_loss_kernel(x_ref, t_ref, w_ref, o_ref, *, c, gamma, n, tm,
                       tiles_per_part):
    p = pl.program_id(0)              # partition index   ("parallel")
    i = pl.program_id(1)              # tile within part  ("arbitrary")

    @pl.when(i == 0)
    def _init():
        o_ref[...] = jnp.zeros_like(o_ref)

    samples_per_tile = tm * 128
    tile = p * tiles_per_part + i
    tile_start = tile * samples_per_tile

    @pl.when(tile_start < n)          # skip fully padded tiles entirely
    def _compute():
        # Class planes as dense (TM, 128) f32 slabs (class axis is the
        # leading, untiled block dim -> class reduction is pure VPU).
        xs = [x_ref[cc].astype(jnp.float32) for cc in range(c)]
        m = xs[0]
        for cc in range(1, c):
            m = jnp.maximum(m, xs[cc])
        s = jnp.exp(xs[0] - m)
        for cc in range(1, c):
            s = s + jnp.exp(xs[cc] - m)

        t = t_ref[...]                                       # (TM,128) int32
        # Gather logit[target] and alpha[target] with chained compare+select;
        # the per-class masks are shared between the two gathers.
        x_t = xs[0]
        a_t = jnp.full(t.shape, w_ref[0], dtype=jnp.float32)
        for cc in range(1, c):
            sel = t == cc
            x_t = jnp.where(sel, xs[cc], x_t)
            a_t = jnp.where(sel, w_ref[cc], a_t)

        logp_t = (x_t - m) - jnp.log(s)                      # log softmax[t]
        ce = -logp_t                                         # cross entropy
        pt = jnp.exp(logp_t)                                 # == exp(-ce)
        base = jnp.maximum(1.0 - pt, 0.0)                    # clamp (header)
        focal = a_t * _static_pow(base, gamma) * ce          # (TM, 128)

        @pl.when(tile_start + samples_per_tile <= n)         # interior tile
        def _acc_full():
            o_ref[...] += focal

        @pl.when(tile_start + samples_per_tile > n)          # boundary only
        def _acc_edge():
            rows = jax.lax.broadcasted_iota(jnp.int32, (tm, 128), 0)
            lanes = jax.lax.broadcasted_iota(jnp.int32, (tm, 128), 1)
            sidx = tile_start + rows * 128 + lanes           # global sample id
            o_ref[...] += jnp.where(sidx < n, focal, 0.0)


def forex_focal_loss(logits, targets, *, alpha=0.25, gamma=2.0,
                     class_weights=None, market_regime="normal",
                     block_n=16384):
    """Pallas TPU implementation of ForexFocalLoss.forward (mean focal loss)."""
    if market_regime == "high_volatility":
        g = gamma * 1.25
    elif market_regime == "low_volatility":
        g = gamma * 0.8
    else:
        g = gamma

    n, c = logits.shape

    # ---- tiling ------------------------------------------------------------
    nr_needed = pl.cdiv(n, 128)                      # rows of 128 samples
    tm = max(16, min(512, _round_up(int(block_n) // 128, 16)))
    cores = _tensorcores_per_device()
    if cores >= 2 and nr_needed >= 8 * 16:
        # give both TensorCores >= 4 tiles each so they can pipeline
        tm = min(tm, _round_up(pl.cdiv(nr_needed, 8), 16))
    tm = min(tm, _round_up(nr_needed, 16))           # don't over-pad small N

    num_tiles = pl.cdiv(nr_needed, tm)
    num_parts = 2 if (cores >= 2 and num_tiles >= 8) else 1
    tiles_per_part = pl.cdiv(num_tiles, num_parts)
    nr_pad = num_parts * tiles_per_part * tm
    n_pad = nr_pad * 128

    # ---- dense lane/sublane packing -----------------------------------------
    # (N, C) -> (C, Nr_pad, 128), row-major pad+reshape with the class axis
    # leading.  allow_input_fusion lets XLA fuse this relayout into the
    # pallas_call input DMA instead of a separate HBM round trip.
    x = jnp.pad(logits, ((0, n_pad - n), (0, 0)))
    x = jnp.transpose(x.reshape(nr_pad, 128, c), (2, 0, 1))
    t = jnp.pad(targets.astype(jnp.int32), (0, n_pad - n)).reshape(nr_pad, 128)

    if class_weights is None:
        w = jnp.full((c,), float(alpha), dtype=jnp.float32)
    else:
        w = jnp.asarray(class_weights, dtype=jnp.float32).reshape((c,))

    kernel = functools.partial(_focal_loss_kernel, c=c, gamma=float(g), n=n,
                               tm=tm, tiles_per_part=tiles_per_part)

    itemsize = jnp.dtype(logits.dtype).itemsize
    cost = pl.CostEstimate(
        flops=(10 * c + 16) * n_pad,
        transcendentals=(c + 2) * n_pad,
        bytes_accessed=n_pad * c * itemsize + n_pad * 4 + c * 4
                       + num_parts * tm * 128 * 4,
    )

    partials = pl.pallas_call(
        kernel,
        out_shape=jax.ShapeDtypeStruct((num_parts, tm, 128), jnp.float32),
        grid=(num_parts, tiles_per_part),
        in_specs=[
            pl.BlockSpec((c, tm, 128),
                         lambda p, i, _t=tiles_per_part: (0, p * _t + i, 0)),
            pl.BlockSpec((tm, 128),
                         lambda p, i, _t=tiles_per_part: (p * _t + i, 0)),
            pl.BlockSpec(memory_space=pltpu.MemorySpace.SMEM),
        ],
        # Output block index depends only on p -> the block stays resident
        # across the whole "arbitrary" axis and acts as the accumulator.
        out_specs=pl.BlockSpec((None, tm, 128), lambda p, i: (p, 0, 0)),
        compiler_params=pltpu.CompilerParams(
            dimension_semantics=("parallel", "arbitrary"),
            vmem_limit_bytes=_vmem_limit_bytes(),
            allow_input_fusion=[True, True, False],
        ),
        cost_estimate=cost,
    )(x, t, w)

    # One tiny host-side reduction over (num_parts, TM, 128) partial sums.
    return jnp.sum(partials) / jnp.float32(n)


def _reference(logits, targets, alpha, gamma, class_weights, market_regime):
    if market_regime == "high_volatility":
        g = gamma * 1.25
    elif market_regime == "low_volatility":
        g = gamma * 0.8
    else:
        g = gamma
    logp = jax.nn.log_softmax(logits.astype(jnp.float32), axis=-1)
    ce = -jnp.take_along_axis(logp, targets[:, None], axis=-1)[:, 0]
    pt = jnp.exp(-ce)
    if class_weights is None:
        a_t = alpha
    else:
        a_t = jnp.asarray(class_weights, jnp.float32)[targets]
    return jnp.mean(a_t * (1.0 - pt) ** g * ce)


if __name__ == "__main__":
    key = jax.random.PRNGKey(0)
    k_logits, k_targets = jax.random.split(key)

    N, C = 8, 4  # batch of 8 samples, 4 classes (e.g. buy/sell/hold/flat)
    logits = jax.random.normal(k_logits, (N, C), dtype=jnp.float32)
    targets = jax.random.randint(k_targets, (N,), 0, C, dtype=jnp.int32)

    loss = forex_focal_loss(logits, targets, alpha=0.25, gamma=2.0,
                            market_regime="normal")
    loss = jax.block_until_ready(loss)
    ref = _reference(logits, targets, 0.25, 2.0, None, "normal")
    assert jnp.allclose(loss, ref, rtol=2e-5, atol=1e-6), (loss, ref)

    # Regime rescale (gamma=2.5 -> x*x*sqrt(x) path) + per-class weights.
    cw = jnp.array([1.0, 2.0, 0.5, 1.5], dtype=jnp.float32)
    loss_hv = forex_focal_loss(logits, targets, alpha=0.25, gamma=2.0,
                               class_weights=cw,
                               market_regime="high_volatility")
    loss_hv = jax.block_until_ready(loss_hv)
    ref_hv = _reference(logits, targets, 0.25, 2.0, cw, "high_volatility")
    assert jnp.allclose(loss_hv, ref_hv, rtol=2e-5, atol=1e-6), (loss_hv, ref_hv)

    # bf16 inputs pass through in native dtype (cast to f32 per slab inside
    # the kernel); also exercises the fractional-gamma (1.6) fallback path.
    logits_bf16 = logits.astype(jnp.bfloat16)
    loss_lv = forex_focal_loss(logits_bf16, targets, alpha=0.25, gamma=2.0,
                               market_regime="low_volatility")
    loss_lv = jax.block_until_ready(loss_lv)
    ref_lv = _reference(logits_bf16, targets, 0.25, 2.0, None, "low_volatility")
    assert jnp.allclose(loss_lv, ref_lv, rtol=1e-4, atol=1e-5), (loss_lv, ref_lv)

    print("KERNEL_OK")
</pallas_src>

<mosaic_0001>
module attributes {stable_mosaic.version = 11 : i64} {
  func.func @_focal_loss_kernel(%arg0: i32, %arg1: i32, %arg2: memref<4x16x128xf32, #tpu.memory_space<vmem>>, %arg3: memref<16x128xi32, #tpu.memory_space<vmem>>, %arg4: memref<4xf32, #tpu.memory_space<smem>>, %arg5: memref<1x16x128xf32, #tpu.memory_space<vmem>>) attributes {dimension_semantics = [#tpu.dimension_semantics<parallel>, #tpu.dimension_semantics<arbitrary>], iteration_bounds = array<i64: 1, 1>, scalar_prefetch = 0 : i64, scratch_operands = 0 : i64, tpu.core_type = #tpu.core_type<tc>, window_params = [{transform_indices = @transform_0, window_bounds = array<i64: 4, 16, 128>}, {transform_indices = @transform_1, window_bounds = array<i64: 16, 128>}, {transform_indices = @transform_2, window_bounds = array<i64: 4>}, {transform_indices = @transform_3, window_bounds = array<i64: 1, 16, 128>}]} {
    %c0_i32 = arith.constant 0 : i32
    %0 = arith.cmpi eq, %arg1, %c0_i32 : i32
    %1 = arith.extui %0 : i1 to i32
    %c0_i32_0 = arith.constant 0 : i32
    %2 = arith.cmpi ne, %1, %c0_i32_0 : i32
    scf.if %2 {
      %cst = arith.constant 0.000000e+00 : f32
      %9 = vector.broadcast %cst : f32 to vector<16x128xf32>
      %c0 = arith.constant 0 : index
      %c0_2 = arith.constant 0 : index
      %c0_3 = arith.constant 0 : index
      %10 = vector.load %arg5[%c0, %c0_2, %c0_3] : memref<1x16x128xf32, #tpu.memory_space<vmem>>, vector<1x16x128xf32>
      %11 = vector.shape_cast %10 : vector<1x16x128xf32> to vector<16x128xf32>
      %12 = vector.shape_cast %9 : vector<16x128xf32> to vector<1x16x128xf32>
      tpu.vector_store %arg5[%c0, %c0_2, %c0_3], %12 {strides = array<i32>} : memref<1x16x128xf32, #tpu.memory_space<vmem>>, vector<1x16x128xf32>,
    } else {
    }
    %c1_i32 = arith.constant 1 : i32
    %3 = arith.muli %arg0, %c1_i32 : i32
    %4 = arith.addi %3, %arg1 : i32
    %c2048_i32 = arith.constant 2048 : i32
    %5 = arith.muli %4, %c2048_i32 : i32
    %c8_i32 = arith.constant 8 : i32
    %6 = arith.cmpi slt, %5, %c8_i32 : i32
    %7 = arith.extui %6 : i1 to i32
    %c0_i32_1 = arith.constant 0 : i32
    %8 = arith.cmpi ne, %7, %c0_i32_1 : i32
    scf.if %8 {
      %c0 = arith.constant 0 : index
      %c0_2 = arith.constant 0 : index
      %c0_3 = arith.constant 0 : index
      %9 = vector.load %arg2[%c0, %c0_2, %c0_3] : memref<4x16x128xf32, #tpu.memory_space<vmem>>, vector<1x16x128xf32>
      %10 = vector.shape_cast %9 : vector<1x16x128xf32> to vector<16x128xf32>
      %c1 = arith.constant 1 : index
      %c0_4 = arith.constant 0 : index
      %c0_5 = arith.constant 0 : index
      %11 = vector.load %arg2[%c1, %c0_4, %c0_5] : memref<4x16x128xf32, #tpu.memory_space<vmem>>, vector<1x16x128xf32>
      %12 = vector.shape_cast %11 : vector<1x16x128xf32> to vector<16x128xf32>
      %c2 = arith.constant 2 : index
      %c0_6 = arith.constant 0 : index
      %c0_7 = arith.constant 0 : index
      %13 = vector.load %arg2[%c2, %c0_6, %c0_7] : memref<4x16x128xf32, #tpu.memory_space<vmem>>, vector<1x16x128xf32>
      %14 = vector.shape_cast %13 : vector<1x16x128xf32> to vector<16x128xf32>
      %c3 = arith.constant 3 : index
      %c0_8 = arith.constant 0 : index
      %c0_9 = arith.constant 0 : index
      %15 = vector.load %arg2[%c3, %c0_8, %c0_9] : memref<4x16x128xf32, #tpu.memory_space<vmem>>, vector<1x16x128xf32>
      %16 = vector.shape_cast %15 : vector<1x16x128xf32> to vector<16x128xf32>
      %17 = arith.maximumf %10, %12 : vector<16x128xf32>
      %18 = arith.maximumf %17, %14 : vector<16x128xf32>
      %19 = arith.maximumf %18, %16 : vector<16x128xf32>
      %20 = arith.subf %10, %19 : vector<16x128xf32>
      %21 = math.exp %20 : vector<16x128xf32>
      %22 = arith.subf %12, %19 : vector<16x128xf32>
      %23 = math.exp %22 : vector<16x128xf32>
      %24 = arith.addf %21, %23 : vector<16x128xf32>
      %25 = arith.subf %14, %19 : vector<16x128xf32>
      %26 = math.exp %25 : vector<16x128xf32>
      %27 = arith.addf %24, %26 : vector<16x128xf32>
      %28 = arith.subf %16, %19 : vector<16x128xf32>
      %29 = math.exp %28 : vector<16x128xf32>
      %30 = arith.addf %27, %29 : vector<16x128xf32>
      %c0_10 = arith.constant 0 : index
      %c0_11 = arith.constant 0 : index
      %31 = vector.load %arg3[%c0_10, %c0_11] : memref<16x128xi32, #tpu.memory_space<vmem>>, vector<16x128xi32>
      %c0_12 = arith.constant 0 : index
      %32 = memref.load %arg4[%c0_12] : memref<4xf32, #tpu.memory_space<smem>>
      %33 = vector.broadcast %32 : f32 to vector<16x128xf32>
      %c1_i32_13 = arith.constant 1 : i32
      %34 = vector.broadcast %c1_i32_13 : i32 to vector<16x128xi32>
      %35 = arith.cmpi eq, %31, %34 : vector<16x128xi32>
      %36 = arith.select %35, %12, %10 : vector<16x128xi1>, vector<16x128xf32>
      %c1_14 = arith.constant 1 : index
      %37 = memref.load %arg4[%c1_14] : memref<4xf32, #tpu.memory_space<smem>>
      %38 = vector.broadcast %37 : f32 to vector<16x128xf32>
      %39 = arith.select %35, %38, %33 : vector<16x128xi1>, vector<16x128xf32>
      %c2_i32 = arith.constant 2 : i32
      %40 = vector.broadcast %c2_i32 : i32 to vector<16x128xi32>
      %41 = arith.cmpi eq, %31, %40 : vector<16x128xi32>
      %42 = arith.select %41, %14, %36 : vector<16x128xi1>, vector<16x128xf32>
      %c2_15 = arith.constant 2 : index
      %43 = memref.load %arg4[%c2_15] : memref<4xf32, #tpu.memory_space<smem>>
      %44 = vector.broadcast %43 : f32 to vector<16x128xf32>
      %45 = arith.select %41, %44, %39 : vector<16x128xi1>, vector<16x128xf32>
      %c3_i32 = arith.constant 3 : i32
      %46 = vector.broadcast %c3_i32 : i32 to vector<16x128xi32>
      %47 = arith.cmpi eq, %31, %46 : vector<16x128xi32>
      %48 = arith.select %47, %16, %42 : vector<16x128xi1>, vector<16x128xf32>
      %c3_16 = arith.constant 3 : index
      %49 = memref.load %arg4[%c3_16] : memref<4xf32, #tpu.memory_space<smem>>
      %50 = vector.broadcast %49 : f32 to vector<16x128xf32>
      %51 = arith.select %47, %50, %45 : vector<16x128xi1>, vector<16x128xf32>
      %52 = arith.subf %48, %19 : vector<16x128xf32>
      %53 = math.log %30 : vector<16x128xf32>
      %54 = arith.subf %52, %53 : vector<16x128xf32>
      %cst = arith.constant 0.000000e+00 : f32
      %55 = vector.broadcast %cst : f32 to vector<16x128xf32>
      %56 = arith.subf %55, %54 : vector<16x128xf32>
      %57 = math.exp %54 : vector<16x128xf32>
      %cst_17 = arith.constant 1.000000e+00 : f32
      %58 = vector.broadcast %cst_17 : f32 to vector<16x128xf32>
      %59 = arith.subf %58, %57 : vector<16x128xf32>
      %cst_18 = arith.constant 0.000000e+00 : f32
      %60 = vector.broadcast %cst_18 : f32 to vector<16x128xf32>
      %61 = arith.maximumf %59, %60 : vector<16x128xf32>
      %62 = arith.mulf %61, %61 : vector<16x128xf32>
      %63 = arith.mulf %51, %62 : vector<16x128xf32>
      %64 = arith.mulf %63, %56 : vector<16x128xf32>
      %c2048_i32_19 = arith.constant 2048 : i32
      %65 = arith.addi %5, %c2048_i32_19 : i32
      %c8_i32_20 = arith.constant 8 : i32
      %66 = arith.cmpi sle, %65, %c8_i32_20 : i32
      %67 = arith.extui %66 : i1 to i32
      %c0_i32_21 = arith.constant 0 : i32
      %68 = arith.cmpi ne, %67, %c0_i32_21 : i32
      scf.if %68 {
        %c0_25 = arith.constant 0 : index
        %c0_26 = arith.constant 0 : index
        %c0_27 = arith.constant 0 : index
        %73 = vector.load %arg5[%c0_25, %c0_26, %c0_27] : memref<1x16x128xf32, #tpu.memory_space<vmem>>, vector<1x16x128xf32>
        %74 = vector.shape_cast %73 : vector<1x16x128xf32> to vector<16x128xf32>
        %75 = arith.addf %74, %64 : vector<16x128xf32>
        %c0_28 = arith.constant 0 : index
        %c0_29 = arith.constant 0 : index
        %c0_30 = arith.constant 0 : index
        %76 = vector.load %arg5[%c0_28, %c0_29, %c0_30] : memref<1x16x128xf32, #tpu.memory_space<vmem>>, vector<1x16x128xf32>
        %77 = vector.shape_cast %76 : vector<1x16x128xf32> to vector<16x128xf32>
        %78 = vector.shape_cast %75 : vector<16x128xf32> to vector<1x16x128xf32>
        tpu.vector_store %arg5[%c0_28, %c0_29, %c0_30], %78 {strides = array<i32>} : memref<1x16x128xf32, #tpu.memory_space<vmem>>, vector<1x16x128xf32>,
      } else {
      }
      %c2048_i32_22 = arith.constant 2048 : i32
      %69 = arith.addi %5, %c2048_i32_22 : i32
      %c8_i32_23 = arith.constant 8 : i32
      %70 = arith.cmpi sgt, %69, %c8_i32_23 : i32
      %71 = arith.extui %70 : i1 to i32
      %c0_i32_24 = arith.constant 0 : i32
      %72 = arith.cmpi ne, %71, %c0_i32_24 : i32
      scf.if %72 {
        %73 = tpu.iota {dimensions = array<i32: 0>} : vector<16x128xi32>
        %74 = tpu.iota {dimensions = array<i32: 1>} : vector<16x128xi32>
        %c128_i32 = arith.constant 128 : i32
        %75 = vector.broadcast %c128_i32 : i32 to vector<16x128xi32>
        %76 = arith.muli %73, %75 : vector<16x128xi32>
        %77 = vector.broadcast %5 : i32 to vector<16x128xi32>
        %78 = arith.addi %77, %76 : vector<16x128xi32>
        %79 = arith.addi %78, %74 : vector<16x128xi32>
        %c0_25 = arith.constant 0 : index
        %c0_26 = arith.constant 0 : index
        %c0_27 = arith.constant 0 : index
        %80 = vector.load %arg5[%c0_25, %c0_26, %c0_27] : memref<1x16x128xf32, #tpu.memory_space<vmem>>, vector<1x16x128xf32>
        %81 = vector.shape_cast %80 : vector<1x16x128xf32> to vector<16x128xf32>
        %c8_i32_28 = arith.constant 8 : i32
        %82 = vector.broadcast %c8_i32_28 : i32 to vector<16x128xi32>
        %83 = arith.cmpi slt, %79, %82 : vector<16x128xi32>
        %cst_29 = arith.constant 0.000000e+00 : f32
        %84 = vector.broadcast %cst_29 : f32 to vector<16x128xf32>
        %85 = arith.select %83, %64, %84 : vector<16x128xi1>, vector<16x128xf32>
        %86 = arith.addf %81, %85 : vector<16x128xf32>
        %c0_30 = arith.constant 0 : index
        %c0_31 = arith.constant 0 : index
        %c0_32 = arith.constant 0 : index
        %87 = vector.load %arg5[%c0_30, %c0_31, %c0_32] : memref<1x16x128xf32, #tpu.memory_space<vmem>>, vector<1x16x128xf32>
        %88 = vector.shape_cast %87 : vector<1x16x128xf32> to vector<16x128xf32>
        %89 = vector.shape_cast %86 : vector<16x128xf32> to vector<1x16x128xf32>
        tpu.vector_store %arg5[%c0_30, %c0_31, %c0_32], %89 {strides = array<i32>} : memref<1x16x128xf32, #tpu.memory_space<vmem>>, vector<1x16x128xf32>,
      } else {
      }
    } else {
    }
    return
  }
  func.func @transform_0(%arg0: i32, %arg1: i32) -> (i32, i32, i32) {
    %c1_i32 = arith.constant 1 : i32
    %0 = arith.muli %arg0, %c1_i32 : i32
    %1 = arith.addi %0, %arg1 : i32
    %c0_i32 = arith.constant 0 : i32
    %c0_i32_0 = arith.constant 0 : i32
    %c0_i32_1 = arith.constant 0 : i32
    return %c0_i32, %1, %c0_i32_0 : i32, i32, i32
  }
  func.func @transform_1(%arg0: i32, %arg1: i32) -> (i32, i32) {
    %c1_i32 = arith.constant 1 : i32
    %0 = arith.muli %arg0, %c1_i32 : i32
    %1 = arith.addi %0, %arg1 : i32
    %c0_i32 = arith.constant 0 : i32
    %c0_i32_0 = arith.constant 0 : i32
    return %1, %c0_i32 : i32, i32
  }
  func.func @transform_2(%arg0: i32, %arg1: i32) -> i32 {
    %c0_i32 = arith.constant 0 : i32
    %c0_i32_0 = arith.constant 0 : i32
    return %c0_i32 : i32
  }
  func.func @transform_3(%arg0: i32, %arg1: i32) -> (i32, i32, i32) {
    %c0_i32 = arith.constant 0 : i32
    %c0_i32_0 = arith.constant 0 : i32
    %c0_i32_1 = arith.constant 0 : i32
    return %arg0, %c0_i32, %c0_i32_0 : i32, i32, i32
  }
}

</mosaic_0001>

<bundles_post_ra>
// kernel: tpu_custom_call.1
= control target key start
LH: loop header
LB: loop body
LE: loop exit
PB: predicated region body
PF: predicated region fallthrough
CT: control target
= control target key end

     0   :  { %8 = vsyncpa [#allocation3], 0  ;;  %s465_s0 = inlined_call_operand.hbm [shape: f32[4,16,128], index: 0, kind: input, shape index: {}]   ;;  %s466_s1 = inlined_call_operand.hbm [shape: s32[16,128], index: 1, kind: input, shape index: {}]   ;;  %s467_s2 = inlined_call_operand.vmem [shape: f32[4], index: 2, kind: input, shape index: {}]   ;;  %s468_s3 = inlined_call_operand.hbm [shape: f32[1,16,128], index: 3, kind: output, shape index: {}]  }
   0x1   :  { %9 = vsyncpa [#allocation7], 0 }
   0x2   :  { %10 = vsyncpa [#allocation5], 0 }
   0x3   :  { %11 = vsyncpa [#allocation4], 0  ;;  %s20_s14 = sshll.u32 %s465_s0, 4  ;;  %s367_s15 = smov [#allocation2]   ;;  %s21_s14 = int_to_ptr.hbm [resolvable:$true] %s20_s14 }
   0x4   :  { %s22_s16 = sshll.u32 %s367_s15, 4  ;;  %s37_s19 = sshll.u32 %s466_s1, 4  ;;  %s23_s16 = int_to_ptr.vmem [resolvable:$true] %s22_s16  ;;  %s38_s19 = int_to_ptr.hbm [resolvable:$true] %s37_s19 }
   0x5   :  { %s368_s20 = smov 128   ;;  %s369_s21 = smov 8  }
   0x6   :  { %28 = dma.hbm_to_vmem [thread:$0]  %s21_s14, 1024, %s23_s16, [#allocation3], %s368_s20, %s368_s20, %s369_s21  }
   0x7   :  { %s370_s22 = smov [#allocation6]   ;;  %s51_s0 = sshll.u32 %s467_s2, 4  ;;  %s52_s0 = int_to_ptr.vmem [resolvable:$true] %s51_s0 }
   0x8   :  { %s39_s23 = sshll.u32 %s370_s22, 4  ;;  %s371_s1 = smov [#allocation8]   ;;  %s40_s23 = int_to_ptr.vmem [resolvable:$true] %s39_s23 }
   0x9   :  { %45 = dma.hbm_to_vmem [thread:$0]  %s38_s19, 256, %s40_s23, [#allocation7], %s368_s20, %s368_s20, %s369_s21  }
   0xa   :  { %54 = dma.vmem_to_smem %s52_s0, 16, %s371_s1, [#allocation5]  }
   0xb   :  { %359 = dma.done.wait [#allocation3], 1024  }
   0xc   :  { %360 = vsyncadd [#allocation3], 4294966272 }
   0xd   :  { %361 = dma.done.wait [#allocation7], 256  }
   0xe   :  { %362 = vsyncadd [#allocation7], 4294967040 }
   0xf   :  { %363 = dma.done.wait [#allocation5], 16  }
  0x10   :  { %364 = vsyncadd [#allocation5], 4294967280 }
  0x11   :  { %67 = sfence }
  0x12   :  { %v84_v0 = vld [vmem:[#allocation2] sm:$0xff]  ;;  %v87_v1 = vld [vmem:[#allocation2 + $0x10] sm:$0xff]  ;;  %v85_v4 = vld [vmem:[#allocation2 + $0x8] sm:$0xff]  ;;  %s133_s2 = sld [smem:[#allocation8]]  ;;  %v198_v59 = vlaneseq  ;;  %s372_s29 = smov [#allocation9]  }
  0x13   :  { %v90_v2 = vld [vmem:[#allocation2 + $0x20] sm:$0xff]  ;;  %v95_v3 = vmax.f32 %v84_v0, %v87_v1  ;;  %v93_v5 = vld [vmem:[#allocation2 + $0x30] sm:$0xff]  ;;  %v88_v6 = vld [vmem:[#allocation2 + $0x18] sm:$0xff]  ;;  %s241_s26 = sld [smem:[#allocation8 + $0x1]]  ;;  %s224_s30 = sshll.u32 %s372_s29, 4  ;;  %s225_s30 = int_to_ptr.vmem [resolvable:$true] %s224_s30 }
  0x14   :  { %v91_v8 = vld [vmem:[#allocation2 + $0x28] sm:$0xff]  ;;  %v96_v9 = vmax.f32 %v85_v4, %v88_v6  ;;  %v94_v11 = vld [vmem:[#allocation2 + $0x38] sm:$0xff]  ;;  %v420_v30 = vld [vmem:[#allocation6] sm:$0xff]  ;;  %s443_s27 = sld [smem:[#allocation8 + $0x2]]  ;;  %s226_s6 = sshll.u32 %s468_s3, 4  ;;  %s227_s6 = int_to_ptr.hbm [resolvable:$true] %s226_s6 }
  0x15   :  { %v97_v7 = vmax.f32 %v95_v3, %v90_v2  ;;  %vm135_vm0 = vcmp.eq.s32.totalorder %v420_v30, 1  ;;  %v423_v35 = vld [vmem:[#allocation6 + $0x8] sm:$0xff]  ;;  %vm143_vm1 = vcmp.eq.s32.totalorder %v420_v30, 2  ;;  %vm151_vm3 = vcmp.eq.s32.totalorder %v420_v30, 3  ;;  %s243_s28 = sld [smem:[#allocation8 + $0x3]] }
  0x16   :  { %v98_v12 = vmax.f32 %v96_v9, %v91_v8  ;;  %v137_v39 = vsel %vm135_vm0, %v87_v1, %v84_v0  ;;  %vm136_vm2 = vcmp.eq.s32.totalorder %v423_v35, 1  ;;  %vm144_vm4 = vcmp.eq.s32.totalorder %v423_v35, 2 }
  0x17   :  { %v408_v10 = vmax.f32 %v97_v7, %v93_v5  ;;  %v145_v45 = vsel %vm143_vm1, %v90_v2, %v137_v39  ;;  %v138_v47 = vsel %vm136_vm2, %v88_v6, %v85_v4  ;;  %vm152_vm5 = vcmp.eq.s32.totalorder %v423_v35, 3 }
  0x18   :  { %v414_v17 = vmax.f32 %v98_v12, %v94_v11  ;;  %v153_v48 = vsel %vm151_vm3, %v93_v5, %v145_v45  ;;  %v146_v50 = vsel %vm144_vm4, %v91_v8, %v138_v47  ;;  %v134_v62 = vstv %s133_s2 }
  0x19   :  { %v101_v13 = vsub.f32 %v84_v0, %v408_v10  ;;  %v107_v14 = vsub.f32 %v87_v1, %v408_v10  ;;  %v115_v15 = vsub.f32 %v90_v2, %v408_v10  ;;  %v123_v16 = vsub.f32 %v93_v5, %v408_v10 }
  0x1a   :  { %v102_v22 = vsub.f32 %v85_v4, %v414_v17  ;;  %v108_v23 = vsub.f32 %v88_v6, %v414_v17  ;;  %v116_v24 = vsub.f32 %v91_v8, %v414_v17  ;;  %v124_v26 = vsub.f32 %v94_v11, %v414_v17 }
  0x1b   :  { %v103_v18 = vmul.f32 1.442695, %v101_v13  ;;  %v109_v19 = vmul.f32 1.442695, %v107_v14  ;;  %v117_v20 = vmul.f32 1.442695, %v115_v15  ;;  %v159_v51 = vsub.f32 %v153_v48, %v408_v10 }
  0x1c   :  { %v125_v21 = vmul.f32 1.442695, %v123_v16  ;;  %v105_v25 = vmul.f32 1.442695, %v102_v22  ;;  %v111_v27 = vmul.f32 1.442695, %v108_v23  ;;  %v154_v53 = vsel %vm152_vm5, %v94_v11, %v146_v50 }
  0x1d   :  { %251 = vpow2.f32 %v103_v18  ;;  %v119_v28 = vmul.f32 1.442695, %v116_v24  ;;  %v127_v29 = vmul.f32 1.442695, %v124_v26  ;;  %v160_v56 = vsub.f32 %v154_v53, %v414_v17 }
  0x1e   :  { %253 = vpow2.f32 %v109_v19  ;;  %v140_v63 = vstv %s241_s26  ;;  %v199_v0 = vshrl.u32 %v198_v59, 7  ;;  %v148_v3 = vstv %s443_s27 }
  0x1f   :  { %255 = vpow2.f32 %v117_v20  ;;  %v141_v2 = vsel %vm135_vm0, %v140_v63, %v134_v62  ;;  %v202_v5 = vand.u32 127, %v198_v59  ;;  %v156_v9 = vstv %s243_s28 }
  0x20   :  { %257 = vpow2.f32 %v125_v21  ;;  %v203_v6 = vmul.u32 128, %v199_v0  ;;  %v200_v7 = vadd.s32 8, %v199_v0  ;;  %v149_v8 = vsel %vm143_vm1, %v148_v3, %v141_v2 }
  0x21   :  { %259 = vpow2.f32 %v105_v25  ;;  %v142_v11 = vsel %vm136_vm2, %v140_v63, %v134_v62  ;;  %v157_v14 = vsel %vm151_vm3, %v156_v9, %v149_v8 }
  0x22   :  { %261 = vpow2.f32 %v111_v27  ;;  %v208_v15 = vadd.s32 %v203_v6, %v202_v5  ;;  %v204_v16 = vmul.u32 128, %v200_v7  ;;  %v150_v19 = vsel %vm144_vm4, %v148_v3, %v142_v11 }
  0x23   :  { %v252_v31 = vpop.eup %251  ;;  %263 = vpow2.f32 %v119_v28  ;;  %v158_v23 = vsel %vm152_vm5, %v156_v9, %v150_v19 }
  0x24   :  { %v254_v32 = vpop.eup %253  ;;  %265 = vpow2.f32 %v127_v29  ;;  %vm212_vm6 = vcmp.lt.s32.totalorder %v208_v15, 8  ;;  %v209_v24 = vadd.s32 %v204_v16, %v202_v5 }
  0x25   :  { %v256_v33 = vpop.eup %255  ;;  %v113_v34 = vadd.f32 %v254_v32, %v252_v31 }
  0x26   :  { %v258_v36 = vpop.eup %257  ;;  %vm213_vm7 = vcmp.lt.s32.totalorder %v209_v24, 8 }
  0x27   :  { %v260_v37 = vpop.eup %259  ;;  %v121_v38 = vadd.f32 %v256_v33, %v113_v34 }
  0x28   :  { %v262_v40 = vpop.eup %261 }
  0x29   :  { %v264_v41 = vpop.eup %263  ;;  %v129_v42 = vadd.f32 %v258_v36, %v121_v38  ;;  %v114_v43 = vadd.f32 %v262_v40, %v260_v37 }
  0x2a   :  { %v266_v44 = vpop.eup %265 }
  0x2b   :  { %267 = vlog2.f32 %v129_v42  ;;  %v122_v46 = vadd.f32 %v264_v41, %v114_v43 }
  0x2d   :  { %v130_v49 = vadd.f32 %v266_v44, %v122_v46 }
  0x2f   :  { %269 = vlog2.f32 %v130_v49 }
  0x31   :  { %v268_v52 = vpop.eup %267 }
  0x32   :  { %v162_v54 = vmul.f32 0.6931472, %v268_v52 }
  0x34   :  { %v165_v55 = vsub.f32 %v159_v51, %v162_v54 }
  0x35   :  { %v270_v57 = vpop.eup %269 }
  0x36   :  { %v169_v58 = vmul.f32 1.442695, %v165_v55  ;;  %v164_v60 = vmul.f32 0.6931472, %v270_v57  ;;  %v167_v17 = vsub.f32 0.0, %v165_v55 }
  0x38   :  { %271 = vpow2.f32 %v169_v58  ;;  %v166_v61 = vsub.f32 %v160_v56, %v164_v60 }
  0x3a   :  { %v171_v1 = vmul.f32 1.442695, %v166_v61  ;;  %v168_v26 = vsub.f32 0.0, %v166_v61 }
  0x3c   :  { %273 = vpow2.f32 %v171_v1 }
  0x3e   :  { %v272_v4 = vpop.eup %271 }
  0x3f   :  { %v173_v10 = vsub.f32 1.0, %v272_v4 }
  0x41   :  { %v175_v12 = vmax.f32 %v173_v10, 0.0 }
  0x42   :  { %v274_v13 = vpop.eup %273 }
  0x43   :  { %v177_v18 = vmul.f32 %v175_v12, %v175_v12  ;;  %v174_v20 = vsub.f32 1.0, %v274_v13 }
  0x45   :  { %v179_v21 = vmul.f32 %v177_v18, %v157_v14  ;;  %v176_v22 = vmax.f32 %v174_v20, 0.0 }
  0x47   :  { %v181_v25 = vmul.f32 %v179_v21, %v167_v17  ;;  %v178_v27 = vmul.f32 %v176_v22, %v176_v22 }
  0x49   :  { %v214_v28 = vsel %vm212_vm6, %v181_v25, 0.0  ;;  %v180_v29 = vmul.f32 %v178_v27, %v158_v23 }
  0x4a   :  { %218 = vst [vmem:[#allocation9] sm:$0xff] %v214_v28 }
  0x4b   :  { %v182_v30 = vmul.f32 %v180_v29, %v168_v26 }
  0x4d   :  { %v215_v31 = vsel %vm213_vm7, %v182_v30, 0.0 }
  0x4e   :  { %219 = vst [vmem:[#allocation9 + $0x8] sm:$0xff] %v215_v31 }
  0x4f   :  { %232 = dma.vmem_to_hbm [thread:$0]  %s225_s30, 256, %s227_s6, [#allocation4], %s368_s20, %s368_s20, %s369_s21  }
  0x50   :  { %365 = dma.done.wait [#allocation4], 256  }
  0x51   :  { %366 = vsyncadd [#allocation4], 4294967040 }
  0x52   :  { %237 = vsyncpa [#allocation3], 1 }
  0x53   :  { %238 = vsyncpa [#allocation7], 1 }
  0x54   :  { %239 = vsyncpa [#allocation4], 1 }
  0x55   :  { %240 = vsyncpa [#allocation5], 1 }

</bundles_post_ra>
